<compile_context>
chip_gen: v7x
topology: tpu7x:2x2x1
jax: 0.10.0
libtpu: 0.0.40
codegen_flags: <defaults>
</compile_context>

<pallas_src>
import math
import jax
import jax.numpy as jnp
from jax.experimental import pallas as pl
from jax.experimental.pallas import tpu as pltpu


def _gelu_exact(x):
    # F.gelu default (exact, erf-based)
    return 0.5 * x * (1.0 + jax.lax.erf(x * (1.0 / math.sqrt(2.0))))


# --------------------------- Pallas kernels ---------------------------------

def _pre_kernel(x_ref, w1_ref, b1_ref, wih_ref, bih_ref, gi_ref):
    """Hoisted, h-independent part: GI = GELU(x@W1+b1) @ W_ih + fused biases."""
    x = x_ref[...].astype(jnp.bfloat16)
    g = _gelu_exact(jnp.dot(x, w1_ref[...],
                            preferred_element_type=jnp.float32) + b1_ref[...])
    gi_ref[...] = (jnp.dot(g.astype(jnp.bfloat16), wih_ref[...],
                           preferred_element_type=jnp.float32) + bih_ref[...])


def _gru_seq_kernel(gi_ref, h0_ref, whh_ref, bhn_ref, hseq_ref, hcar_ref):
    """Sequential GRU recurrence over one time chunk.
    Exactly ONE MXU push per timestep: (B,H) @ (H,3H)."""
    c = pl.program_id(0)

    # Initialize the VMEM-resident hidden-state carry on the first chunk.
    @pl.when(c == 0)
    def _():
        hcar_ref[...] = h0_ref[...]

    TC, B, _ = gi_ref.shape
    H = h0_ref.shape[1]

    # Hoist weight / bias loads & broadcasts out of the unrolled step loop.
    whh = whh_ref[...]                                   # (H, 3H) bf16
    bhn = jnp.broadcast_to(bhn_ref[...], (B, H))         # (B, H)  f32

    h = hcar_ref[...]                                    # (B, H) f32 carry
    for i in range(TC):                                  # fully unrolled, static idx
        gi = gi_ref[i]                                   # (B, 3H) f32 (biases folded)
        hm = jnp.dot(h.astype(jnp.bfloat16), whh,
                     preferred_element_type=jnp.float32)  # (B, 3H) f32
        r = jax.nn.sigmoid(gi[:, :H] + hm[:, :H])
        z = jax.nn.sigmoid(gi[:, H:2 * H] + hm[:, H:2 * H])
        n = jnp.tanh(gi[:, 2 * H:] + r * (hm[:, 2 * H:] + bhn))
        h = (1.0 - z) * n + z * h
        hseq_ref[i] = h
    hcar_ref[...] = h


def _fc2_kernel(h_ref, w2_ref, b2_ref, q_ref):
    """Hoisted fc2: Q = H_seq @ W2 + b2 (padded, lane-dense output)."""
    q_ref[...] = (jnp.dot(h_ref[...].astype(jnp.bfloat16), w2_ref[...],
                          preferred_element_type=jnp.float32) + b2_ref[...])


# --------------------------- parameters --------------------------------------

def init_params(key, input_dim, hidden, n_actions):
    """Raw f32 parameters, same init convention as the PyTorch module
    (stored (in, out) so kernels compute x @ W). GRU gate order is [r, z, n]."""
    ks = jax.random.split(key, 8)

    def u(k, shape, fan_in):
        bound = 1.0 / math.sqrt(fan_in)
        return jax.random.uniform(k, shape, jnp.float32, -bound, bound)

    return dict(
        w1=u(ks[0], (input_dim, hidden), input_dim),
        b1=u(ks[1], (1, hidden), input_dim),
        w_ih=u(ks[2], (hidden, 3 * hidden), hidden),
        b_ih=u(ks[3], (1, 3 * hidden), hidden),
        w_hh=u(ks[4], (hidden, 3 * hidden), hidden),
        b_hh=u(ks[5], (1, 3 * hidden), hidden),
        w2=u(ks[6], (hidden, n_actions), hidden),
        b2=u(ks[7], (1, n_actions), hidden),
    )


def pack_params(p):
    """Kernel-side parameters: bf16 matmul weights, biases pre-fused into the
    input-side projection (only b_hn stays on the serial path), fc2 padded to a
    128-lane multiple for lane-dense stores."""
    bf16 = jnp.bfloat16
    H = p["w1"].shape[1]
    n_actions = p["w2"].shape[1]
    npad = ((n_actions + 127) // 128) * 128

    b_ih, b_hh = p["b_ih"], p["b_hh"]
    b_ih_fused = jnp.concatenate(
        [b_ih[:, :H] + b_hh[:, :H],                 # r: both sides fold
         b_ih[:, H:2 * H] + b_hh[:, H:2 * H],       # z: both sides fold
         b_ih[:, 2 * H:]],                          # n: input side only
        axis=1).astype(jnp.float32)

    w2p = jnp.zeros((H, npad), jnp.float32).at[:, :n_actions].set(p["w2"]).astype(bf16)
    b2p = jnp.zeros((1, npad), jnp.float32).at[:, :n_actions].set(p["b2"])

    return dict(
        w1=p["w1"].astype(bf16), b1=p["b1"].astype(jnp.float32),
        w_ih=p["w_ih"].astype(bf16), b_ih_fused=b_ih_fused,
        w_hh=p["w_hh"].astype(bf16), b_hn=p["b_hh"][:, 2 * H:].astype(jnp.float32),
        w2=w2p, b2=b2p,
        hidden=H, n_actions=n_actions,
    )


# --------------------------- wrappers -----------------------------------------

def rnn_agent_forward_seq(inputs_seq, hidden_state, packed, *, time_chunk=32):
    """Run T GRU-agent steps.  inputs_seq: (T, B, D).
    Returns (q_seq (T, B, n_actions), h_T (B, H))."""
    T, B, D = inputs_seq.shape
    H = packed["hidden"]
    NP = packed["w2"].shape[1]
    n_actions = packed["n_actions"]

    TC = min(time_chunk, T)
    n_chunks = pl.cdiv(T, TC)
    TP = n_chunks * TC

    xs = inputs_seq.astype(jnp.float32)
    if TP != T:
        xs = jnp.concatenate([xs, jnp.zeros((TP - T, B, D), jnp.float32)], axis=0)

    h0 = jnp.broadcast_to(hidden_state.reshape(-1, H), (B, H)).astype(jnp.float32)

    rows = TP * B
    row_tile = TC * B
    if rows % row_tile != 0 or row_tile % 8 != 0:
        row_tile = rows
    n_row_blocks = rows // row_tile

    const2 = lambda c: (0, 0)

    # ---- Phase 1 (parallel): GI = GELU(x@W1+b1) @ W_ih + fused biases -------
    gi_flat = pl.pallas_call(
        _pre_kernel,
        grid=(n_row_blocks,),
        out_shape=jax.ShapeDtypeStruct((rows, 3 * H), jnp.float32),
        in_specs=[
            pl.BlockSpec((row_tile, D), lambda c: (c, 0)),
            pl.BlockSpec((D, H), const2),
            pl.BlockSpec((1, H), const2),
            pl.BlockSpec((H, 3 * H), const2),
            pl.BlockSpec((1, 3 * H), const2),
        ],
        out_specs=pl.BlockSpec((row_tile, 3 * H), lambda c: (c, 0)),
        compiler_params=pltpu.CompilerParams(dimension_semantics=("parallel",)),
    )(xs.reshape(rows, D), packed["w1"], packed["b1"],
      packed["w_ih"], packed["b_ih_fused"])

    gi = gi_flat.reshape(TP, B, 3 * H)

    # ---- Phase 2 (sequential): GRU recurrence, time-chunked grid ------------
    h_seq = pl.pallas_call(
        _gru_seq_kernel,
        grid=(TP // TC,),
        out_shape=jax.ShapeDtypeStruct((TP, B, H), jnp.float32),
        in_specs=[
            pl.BlockSpec((TC, B, 3 * H), lambda c: (c, 0, 0)),   # GI chunk (per step)
            pl.BlockSpec((B, H), const2),                        # h0 (loaded once)
            pl.BlockSpec((H, 3 * H), const2),                    # W_hh (resident)
            pl.BlockSpec((1, H), const2),                        # b_hn
        ],
        out_specs=pl.BlockSpec((TC, B, H), lambda c: (c, 0, 0)),
        scratch_shapes=[pltpu.VMEM((B, H), jnp.float32)],        # h carry across chunks
        compiler_params=pltpu.CompilerParams(dimension_semantics=("arbitrary",)),
    )(gi, h0, packed["w_hh"], packed["b_hn"])

    # ---- Phase 3 (parallel): Q = H_seq @ W2 + b2 (lane-dense padded) --------
    q_flat = pl.pallas_call(
        _fc2_kernel,
        grid=(n_row_blocks,),
        out_shape=jax.ShapeDtypeStruct((rows, NP), jnp.float32),
        in_specs=[
            pl.BlockSpec((row_tile, H), lambda c: (c, 0)),
            pl.BlockSpec((H, NP), const2),
            pl.BlockSpec((1, NP), const2),
        ],
        out_specs=pl.BlockSpec((row_tile, NP), lambda c: (c, 0)),
        compiler_params=pltpu.CompilerParams(dimension_semantics=("parallel",)),
    )(h_seq.reshape(rows, H), packed["w2"], packed["b2"])

    q_seq = q_flat.reshape(TP, B, NP)[:T, :, :n_actions]
    h_T = h_seq[T - 1]
    return q_seq, h_T


def rnn_agent_forward(inputs, hidden_state, packed):
    """Single step, exactly RNNAgent.forward semantics: returns (q, h)."""
    q_seq, h = rnn_agent_forward_seq(inputs[None], hidden_state, packed)
    return q_seq[0], h


# --------------------------- reference & test ---------------------------------

def _reference_step(x, h, p):
    """Pure-JAX f32 reference of the PyTorch module's math."""
    H = p["w1"].shape[1]
    g = _gelu_exact(x @ p["w1"] + p["b1"])
    gi = g @ p["w_ih"] + p["b_ih"]
    gh = h.reshape(-1, H) @ p["w_hh"] + p["b_hh"]
    r = jax.nn.sigmoid(gi[:, :H] + gh[:, :H])
    z = jax.nn.sigmoid(gi[:, H:2 * H] + gh[:, H:2 * H])
    n = jnp.tanh(gi[:, 2 * H:] + r * gh[:, 2 * H:])
    h_new = (1.0 - z) * n + z * h.reshape(-1, H)
    q = h_new @ p["w2"] + p["b2"]
    return q, h_new


if __name__ == "__main__":
    B, INPUT_DIM, HIDDEN, N_ACTIONS, T = 8, 64, 128, 16, 8

    key = jax.random.PRNGKey(0)
    k_param, k_x = jax.random.split(key)

    raw_params = init_params(k_param, INPUT_DIM, HIDDEN, N_ACTIONS)
    packed = pack_params(raw_params)

    xs = jax.random.normal(k_x, (T, B, INPUT_DIM), jnp.float32)
    # init_hidden(): zeros of shape (1, hidden), broadcast to batch
    h0 = jnp.zeros((B, HIDDEN), jnp.float32)

    # ---- single step (matches RNNAgent.forward) ------------------------------
    q, h = rnn_agent_forward(xs[0], h0, packed)
    jax.block_until_ready((q, h))
    q_ref, h_ref = _reference_step(xs[0], h0, raw_params)
    assert jnp.allclose(q, q_ref, atol=5e-2, rtol=5e-2), \
        f"q mismatch, max err {jnp.max(jnp.abs(q - q_ref))}"
    assert jnp.allclose(h, h_ref, atol=5e-2, rtol=5e-2), \
        f"h mismatch, max err {jnp.max(jnp.abs(h - h_ref))}"

    # ---- full sequence (hoisted batched matmuls + sequential GRU kernel) -----
    q_seq, h_T = rnn_agent_forward_seq(xs, h0, packed)
    jax.block_until_ready((q_seq, h_T))

    def _scan_step(h_c, x_t):
        q_t, h_n = _reference_step(x_t, h_c, raw_params)
        return h_n, q_t

    h_ref_T, q_ref_seq = jax.lax.scan(_scan_step, h0, xs)
    assert jnp.allclose(q_seq, q_ref_seq, atol=5e-2, rtol=5e-2), \
        f"q_seq mismatch, max err {jnp.max(jnp.abs(q_seq - q_ref_seq))}"
    assert jnp.allclose(h_T, h_ref_T, atol=5e-2, rtol=5e-2), \
        f"h_T mismatch, max err {jnp.max(jnp.abs(h_T - h_ref_T))}"

    print("KERNEL_OK")
</pallas_src>

<mosaic_0001>
module attributes {stable_mosaic.version = 11 : i64} {
  func.func @_pre_kernel(%arg0: i32, %arg1: memref<8x64xf32, #tpu.memory_space<vmem>>, %arg2: memref<64x128xbf16, #tpu.memory_space<vmem>>, %arg3: memref<1x128xf32, #tpu.memory_space<vmem>>, %arg4: memref<128x384xbf16, #tpu.memory_space<vmem>>, %arg5: memref<1x384xf32, #tpu.memory_space<vmem>>, %arg6: memref<8x384xf32, #tpu.memory_space<vmem>>) attributes {dimension_semantics = [#tpu.dimension_semantics<parallel>], iteration_bounds = array<i64: 1>, scalar_prefetch = 0 : i64, scratch_operands = 0 : i64, tpu.core_type = #tpu.core_type<tc>, window_params = [{transform_indices = @transform_0, window_bounds = array<i64: 8, 64>}, {pipeline_mode = #tpu.pipeline_mode<synchronous>, transform_indices = @transform_1, window_bounds = array<i64: 64, 128>}, {pipeline_mode = #tpu.pipeline_mode<synchronous>, transform_indices = @transform_2, window_bounds = array<i64: 1, 128>}, {pipeline_mode = #tpu.pipeline_mode<synchronous>, transform_indices = @transform_3, window_bounds = array<i64: 128, 384>}, {pipeline_mode = #tpu.pipeline_mode<synchronous>, transform_indices = @transform_4, window_bounds = array<i64: 1, 384>}, {transform_indices = @transform_5, window_bounds = array<i64: 8, 384>}]} {
    %c0 = arith.constant 0 : index
    %c0_0 = arith.constant 0 : index
    %0 = vector.load %arg1[%c0, %c0_0] : memref<8x64xf32, #tpu.memory_space<vmem>>, vector<8x64xf32>
    %1 = arith.truncf %0 : vector<8x64xf32> to vector<8x64xbf16>
    %c0_1 = arith.constant 0 : index
    %c0_2 = arith.constant 0 : index
    %2 = vector.load %arg2[%c0_1, %c0_2] : memref<64x128xbf16, #tpu.memory_space<vmem>>, vector<64x128xbf16>
    %cst = arith.constant dense<0.000000e+00> : vector<8x128xf32>
    %3 = tpu.matmul %1, %2, %cst {dimension_numbers = #tpu.dot_dimension_numbers<[1], [0], [0], [1], [0, 0, 1, 1], [], []>} : vector<8x64xbf16>, vector<64x128xbf16>, vector<8x128xf32> -> vector<8x128xf32>
    %c0_3 = arith.constant 0 : index
    %c0_4 = arith.constant 0 : index
    %4 = vector.load %arg3[%c0_3, %c0_4] : memref<1x128xf32, #tpu.memory_space<vmem>>, vector<1x128xf32>
    %5 = vector.broadcast %4 : vector<1x128xf32> to vector<8x128xf32>
    %6 = arith.addf %3, %5 : vector<8x128xf32>
    %cst_5 = arith.constant 5.000000e-01 : f32
    %7 = vector.broadcast %cst_5 : f32 to vector<8x128xf32>
    %8 = arith.mulf %7, %6 : vector<8x128xf32>
    %cst_6 = arith.constant 0.707106769 : f32
    %9 = vector.broadcast %cst_6 : f32 to vector<8x128xf32>
    %10 = arith.mulf %6, %9 : vector<8x128xf32>
    %11 = math.erf %10 : vector<8x128xf32>
    %cst_7 = arith.constant 1.000000e+00 : f32
    %12 = vector.broadcast %cst_7 : f32 to vector<8x128xf32>
    %13 = arith.addf %12, %11 : vector<8x128xf32>
    %14 = arith.mulf %8, %13 : vector<8x128xf32>
    %15 = arith.truncf %14 : vector<8x128xf32> to vector<8x128xbf16>
    %c0_8 = arith.constant 0 : index
    %c0_9 = arith.constant 0 : index
    %16 = vector.load %arg4[%c0_8, %c0_9] : memref<128x384xbf16, #tpu.memory_space<vmem>>, vector<128x384xbf16>
    %cst_10 = arith.constant dense<0.000000e+00> : vector<8x384xf32>
    %17 = tpu.matmul %15, %16, %cst_10 {dimension_numbers = #tpu.dot_dimension_numbers<[1], [0], [0], [1], [0, 0, 1, 1], [], []>} : vector<8x128xbf16>, vector<128x384xbf16>, vector<8x384xf32> -> vector<8x384xf32>
    %c0_11 = arith.constant 0 : index
    %c0_12 = arith.constant 0 : index
    %18 = vector.load %arg5[%c0_11, %c0_12] : memref<1x384xf32, #tpu.memory_space<vmem>>, vector<1x384xf32>
    %19 = vector.broadcast %18 : vector<1x384xf32> to vector<8x384xf32>
    %20 = arith.addf %17, %19 : vector<8x384xf32>
    %c0_13 = arith.constant 0 : index
    %c0_14 = arith.constant 0 : index
    %21 = vector.load %arg6[%c0_13, %c0_14] : memref<8x384xf32, #tpu.memory_space<vmem>>, vector<8x384xf32>
    tpu.vector_store %arg6[%c0_13, %c0_14], %20 {strides = array<i32>} : memref<8x384xf32, #tpu.memory_space<vmem>>, vector<8x384xf32>,
    return
  }
  func.func @transform_0(%arg0: i32) -> (i32, i32) {
    %c0_i32 = arith.constant 0 : i32
    %c0_i32_0 = arith.constant 0 : i32
    return %arg0, %c0_i32 : i32, i32
  }
  func.func @transform_1(%arg0: i32) -> (i32, i32) {
    %c0_i32 = arith.constant 0 : i32
    %c0_i32_0 = arith.constant 0 : i32
    %c0_i32_1 = arith.constant 0 : i32
    return %c0_i32, %c0_i32_0 : i32, i32
  }
  func.func @transform_2(%arg0: i32) -> (i32, i32) {
    %c0_i32 = arith.constant 0 : i32
    %c0_i32_0 = arith.constant 0 : i32
    %c0_i32_1 = arith.constant 0 : i32
    return %c0_i32, %c0_i32_0 : i32, i32
  }
  func.func @transform_3(%arg0: i32) -> (i32, i32) {
    %c0_i32 = arith.constant 0 : i32
    %c0_i32_0 = arith.constant 0 : i32
    %c0_i32_1 = arith.constant 0 : i32
    return %c0_i32, %c0_i32_0 : i32, i32
  }
  func.func @transform_4(%arg0: i32) -> (i32, i32) {
    %c0_i32 = arith.constant 0 : i32
    %c0_i32_0 = arith.constant 0 : i32
    %c0_i32_1 = arith.constant 0 : i32
    return %c0_i32, %c0_i32_0 : i32, i32
  }
  func.func @transform_5(%arg0: i32) -> (i32, i32) {
    %c0_i32 = arith.constant 0 : i32
    %c0_i32_0 = arith.constant 0 : i32
    return %arg0, %c0_i32 : i32, i32
  }
}

</mosaic_0001>

<bundles_post_ra>
// kernel: tpu_custom_call.1
= control target key start
LH: loop header
LB: loop body
LE: loop exit
PB: predicated region body
PF: predicated region fallthrough
CT: control target
= control target key end

     0   :  { %10 = vsyncpa [#allocation3], 0  ;;  %s759_s0 = inlined_call_operand.hbm [shape: f32[8,64], index: 0, kind: input, shape index: {}]   ;;  %s760_s1 = inlined_call_operand.hbm [shape: bf16[64,128], index: 1, kind: input, shape index: {}]   ;;  %s761_s2 = inlined_call_operand.vmem [shape: f32[1,128], index: 2, kind: input, shape index: {}]   ;;  %s762_s3 = inlined_call_operand.hbm [shape: bf16[128,384], index: 3, kind: input, shape index: {}]   ;;  %s763_s4 = inlined_call_operand.vmem [shape: f32[1,384], index: 4, kind: input, shape index: {}]   ;;  %s764_s5 = inlined_call_operand.hbm [shape: f32[8,384], index: 5, kind: output, shape index: {}]  }
   0x1   :  { %11 = vsyncpa [#allocation6], 0 }
   0x2   :  { %12 = vsyncpa [#allocation4], 0  ;;  %s648_s18 = smov [#allocation5]   ;;  %s554_s22 = scalar_lea.hbm %s760_s1, 512 }
   0x3   :  { %s28_s19 = sshll.u32 %s648_s18, 4  ;;  %p555_p0 = scmp.ne.s32.totalorder %s760_s1, %s554_s22  ;;  %s29_s19 = int_to_ptr.vmem [resolvable:$true] %s28_s19 }
   0x4   :  { %p558_p1 = scmp.lt.u32.totalorder %s554_s22, %s760_s1 }
   0x6   :  { %p560_p2 = pnand %p558_p1, %p555_p0 }
   0x8   :  { %563 = shalt.err (!%p560_p2)
}
   0x9   :  { %s564_s27 = scalar_lea.vmem %s29_s19, 512  ;;  %p569_p4 = scmp.lt.s32.totalorder %s29_s19, %s29_s19 }
   0xa   :  { %p565_p3 = scmp.ne.s32.totalorder %s29_s19, %s564_s27  ;;  %p570_p5 = scmp.lt.s32.totalorder %s564_s27, %s564_s27 }
   0xc   :  { %p571_p6 = por %p570_p5, %p569_p4 }
   0xe   :  { %p572_p7 = pnand %p571_p6, %p565_p3 }
  0x10   :  { %575 = shalt.err (!%p572_p7)
}
  0x11   :  { %s649_s28 = smov 64   ;;  %s650_s29 = smov 4  }
  0x12   :  { %34 = dma.hbm_to_vmem [thread:$0]  %s760_s1, 512, %s29_s19, [#allocation6], %s649_s28, %s649_s28, %s650_s29  }
  0x13   :  { %s651_s7 = smov [#allocation2]   ;;  %s652_s9 = smov [#allocation7]  }
  0x14   :  { %s19_s8 = sshll.u32 %s651_s7, 4  ;;  %s42_s10 = sshll.u32 %s652_s9, 4  ;;  %s20_s8 = int_to_ptr.vmem [resolvable:$true] %s19_s8  ;;  %s43_s10 = int_to_ptr.vmem [resolvable:$true] %s42_s10 }
  0x15   :  { %s576_s13 = scalar_lea.hbm %s759_s0, 128 }
  0x16   :  { %p577_p8 = scmp.ne.s32.totalorder %s759_s0, %s576_s13  ;;  %p580_p9 = scmp.lt.u32.totalorder %s576_s13, %s759_s0 }
  0x18   :  { %p582_p10 = pnand %p580_p9, %p577_p8 }
  0x1a   :  { %585 = shalt.err (!%p582_p10)
}
  0x1b   :  { %s586_s1 = scalar_lea.vmem %s20_s8, 128  ;;  %p591_p12 = scmp.lt.s32.totalorder %s20_s8, %s20_s8 }
  0x1c   :  { %p587_p11 = scmp.ne.s32.totalorder %s20_s8, %s586_s1  ;;  %p592_p13 = scmp.lt.s32.totalorder %s586_s1, %s586_s1 }
  0x1e   :  { %p593_p0 = por %p592_p13, %p591_p12 }
  0x20   :  { %p594_p1 = pnand %p593_p0, %p587_p11 }
  0x22   :  { %597 = shalt.err (!%p594_p1)
}
  0x23   :  { %22 = dma.hbm_to_vmem [thread:$0]  %s759_s0, 128, %s20_s8, [#allocation3]  }
  0x24   :  { %s598_s22 = scalar_lea.hbm %s762_s3, 3072 }
  0x25   :  { %p599_p2 = scmp.ne.s32.totalorder %s762_s3, %s598_s22  ;;  %p602_p3 = scmp.lt.u32.totalorder %s598_s22, %s762_s3 }
  0x27   :  { %p604_p4 = pnand %p602_p3, %p599_p2 }
  0x29   :  { %607 = shalt.err (!%p604_p4)
}
  0x2a   :  { %s608_s27 = scalar_lea.vmem %s43_s10, 3072  ;;  %p613_p6 = scmp.lt.s32.totalorder %s43_s10, %s43_s10 }
  0x2b   :  { %p609_p5 = scmp.ne.s32.totalorder %s43_s10, %s608_s27  ;;  %p614_p7 = scmp.lt.s32.totalorder %s608_s27, %s608_s27 }
  0x2d   :  { %p615_p8 = por %p614_p7, %p613_p6 }
  0x2f   :  { %p616_p9 = pnand %p615_p8, %p609_p5 }
  0x31   :  { %619 = shalt.err (!%p616_p9)
}
  0x32   :  { %s653_s0 = smov 192   ;;  %s654_s28 = smov 12  }
  0x33   :  { %48 = dma.hbm_to_vmem [thread:$0]  %s762_s3, 3072, %s43_s10, [#allocation6], %s653_s0, %s653_s0, %s654_s28  }
  0x34   :  { %642 = dma.done.wait [#allocation3], 128  }
  0x35   :  { %643 = vsyncadd [#allocation3], 4294967168 }
  0x36   :  { %644 = dma.done.wait [#allocation6], 3584  }
  0x37   :  { %645 = vsyncadd [#allocation6], 4294963712  ;;  %v655_v0 = vmov 0.0   ;;  %vm656_vm0 = vmmov 0   ;;  %v516_v1 = vld [vmem:[#allocation5] sm:$0xff]   ;;  %v517_v2 = vld [vmem:[#allocation5 + $0x8] sm:$0xff]   ;;  %v186_v44 = vlaneseq }
  0x38   :  { %473 = vmatprep.subr.bf16.mxu0 %v655_v0  ;;  %481 = vmatprep.mubr.msk.bf16.mxu0 %vm656_vm0, %v655_v0  ;;  %v520_v3 = vld [vmem:[#allocation7 + $0x4] ss:$12 sps:$4 sm:$0xff]   ;;  %v522_v4 = vld [vmem:[#allocation7] ss:$12 sps:$4 sm:$0xff]   ;;  %v524_v6 = vld [vmem:[#allocation7 + $0x1c] ss:$12 sps:$4 sm:$0xff]  }
  0x39   :  { %474 = vmatpush3.bf16.msra.mxu0 %v516_v1  ;;  %v518_v5 = vld [vmem:[#allocation5 + $0x10] sm:$0xff]   ;;  %329 = vmatprep.subr.bf16.mxu1 %v520_v3  ;;  %v519_v7 = vld [vmem:[#allocation5 + $0x18] sm:$0xff]   ;;  %vm102_vm1 = vcmask 523264   ;;  %v527_v14 = vld [vmem:[#allocation7 + $0x20] ss:$12 sps:$4 sm:$0xff]   ;;  %v657_v31 = vmov 0  }
  0x3a   :  { %475 = vmatprep.subr.bf16.mxu0 %v655_v0  ;;  %330 = vmatpush1.bf16.msra.mxu1 %v522_v4  ;;  %v526_v8 = vld [vmem:[#allocation7 + $0x18] ss:$12 sps:$4 sm:$0xff]   ;;  %v528_v9 = vld [vmem:[#allocation7 + $0x34] ss:$12 sps:$4 sm:$0xff]   ;;  %v530_v11 = vld [vmem:[#allocation7 + $0x30] ss:$12 sps:$4 sm:$0xff]  }
  0x3b   :  { %331 = vmatprep.subr.bf16.mxu1 %v524_v6  ;;  %v61_v10 = vld [vmem:[#allocation2] sm:$0xff]  ;;  %v523_v12 = vld [vmem:[#allocation7 + $0x8] ss:$12 sps:$4 sm:$0xff]   ;;  %v536_v19 = vld [vmem:[#allocation7 + $0x64] ss:$12 sps:$4 sm:$0xff]   ;;  %361 = vmatprep.mubr.bf16.mxu1 %v657_v31  ;;  %v187_v45 = vshrl.u32 %v186_v44, 7 }
  0x3c   :  { %v62_v13 = vpack.c.bf16 %v61_v10, %v61_v10  ;;  %v531_v15 = vld [vmem:[#allocation7 + $0x38] ss:$12 sps:$4 sm:$0xff]   ;;  %v534_v17 = vld [vmem:[#allocation7 + $0x48] ss:$12 sps:$4 sm:$0xff]   ;;  %v535_v18 = vld [vmem:[#allocation7 + $0x50] ss:$12 sps:$4 sm:$0xff]  }
  0x3d   :  { %476 = vmatpush3.bf16.msra.mxu0 %v517_v2  ;;  %v532_v16 = vld [vmem:[#allocation7 + $0x4c] ss:$12 sps:$4 sm:$0xff]   ;;  %v539_v21 = vld [vmem:[#allocation7 + $0x68] ss:$12 sps:$4 sm:$0xff]   ;;  %v546_v26 = vld [vmem:[#allocation7 + $0x90] ss:$12 sps:$4 sm:$0xff]  }
  0x3e   :  { %477 = vmatprep.subr.bf16.mxu0 %v655_v0  ;;  %332 = vmatpush1.bf16.msra.mxu1 %v526_v8  ;;  %v538_v20 = vld [vmem:[#allocation7 + $0x60] ss:$12 sps:$4 sm:$0xff]   ;;  %v540_v22 = vld [vmem:[#allocation7 + $0x7c] ss:$12 sps:$4 sm:$0xff]   ;;  %v542_v23 = vld [vmem:[#allocation7 + $0x78] ss:$12 sps:$4 sm:$0xff]  }
  0x3f   :  { %333 = vmatprep.subr.bf16.mxu1 %v528_v9  ;;  %v543_v24 = vld [vmem:[#allocation7 + $0x80] ss:$12 sps:$4 sm:$0xff]   ;;  %v547_v27 = vld [vmem:[#allocation7 + $0x98] ss:$12 sps:$4 sm:$0xff]   ;;  %v550_v29 = vld [vmem:[#allocation7 + $0xa8] ss:$12 sps:$4 sm:$0xff]  }
  0x40   :  { %v544_v25 = vld [vmem:[#allocation7 + $0x94] ss:$12 sps:$4 sm:$0xff]   ;;  %v548_v28 = vld [vmem:[#allocation7 + $0xac] ss:$12 sps:$4 sm:$0xff]   ;;  %v551_v30 = vld [vmem:[#allocation7 + $0xb0] ss:$12 sps:$4 sm:$0xff]  }
  0x41   :  { %478 = vmatpush3.bf16.msra.mxu0 %v518_v5  ;;  %v429_v32 = vld [vmem:[%s761_s2] ss:$0 sm:$0xff]  ;;  %v188_v46 = vsub.s32 0, %v187_v45  ;;  %v196_v47 = vsub.s32 2, %v187_v45  ;;  %v192_v49 = vsub.s32 1, %v187_v45  ;;  %s658_s8 = smov [#allocation8]  }
  0x42   :  { %479 = vmatprep.subr.bf16.mxu0 %v655_v0  ;;  %334 = vmatpush1.bf16.msra.mxu1 %v530_v11  ;;  %v184_v48 = vld [vmem:[%s763_s4] sm:$0x7]  ;;  %s419_s9 = sshll.u32 %s658_s8, 4  ;;  %s420_s9 = int_to_ptr.vmem [resolvable:$true] %s419_s9 }
  0x43   :  { %335 = vmatprep.subr.bf16.mxu1 %v532_v16  ;;  %v189_v50 = vrot.slane %v184_v48, %v188_v46  ;;  %v197_v51 = vrot.slane %v184_v48, %v196_v47  ;;  %v193_v52 = vrot.slane %v184_v48, %v192_v49  ;;  %s620_s4 = scalar_lea.vmem %s420_s9, 384  ;;  %p625_p11 = scmp.lt.s32.totalorder %s420_s9, %s420_s9 }
  0x44   :  { %p621_p10 = scmp.ne.s32.totalorder %s420_s9, %s620_s4  ;;  %p626_p12 = scmp.lt.s32.totalorder %s620_s4, %s620_s4 }
  0x45   :  { %480 = vmatpush3.bf16.msra.mxu0 %v519_v7 }
  0x46   :  { %485 = vmatprep.subr.bf16.mxu0 %v655_v0  ;;  %336 = vmatpush1.bf16.msra.mxu1 %v534_v17  ;;  %p627_p13 = por %p626_p12, %p625_p11 }
  0x47   :  { %337 = vmatprep.subr.bf16.mxu1 %v536_v19 }
  0x48   :  { %482 = vmatmul.mubr.msk.bf16.vlgmr.msra.gmra.mrb[0].mxu0 %vm102_vm1, %v62_v13  ;;  %p628_p0 = pnand %p627_p13, %p621_p10 }
  0x49   :  { %486 = vmatpush3.bf16.msra.mxu0 %v523_v12  ;;  %501 = vmatprep.mubr.msk.bf16.mxu0 %vm656_vm0, %v655_v0 }
  0x4a   :  { %487 = vmatprep.subr.bf16.mxu0 %v655_v0  ;;  %338 = vmatpush1.bf16.msra.mxu1 %v538_v20 }
  0x4b   :  { %339 = vmatprep.subr.bf16.mxu1 %v540_v22 }
  0x4d   :  { %488 = vmatpush3.bf16.msra.mxu0 %v527_v14 }
  0x4e   :  { %489 = vmatprep.subr.bf16.mxu0 %v655_v0  ;;  %340 = vmatpush1.bf16.msra.mxu1 %v542_v23 }
  0x4f   :  { %341 = vmatprep.subr.bf16.mxu1 %v544_v25 }
  0x51   :  { %490 = vmatpush3.bf16.msra.mxu0 %v531_v15 }
  0x52   :  { %491 = vmatprep.subr.bf16.mxu0 %v655_v0  ;;  %342 = vmatpush1.bf16.msra.mxu1 %v546_v26 }
  0x53   :  { %343 = vmatprep.subr.bf16.mxu1 %v548_v28 }
  0x55   :  { %492 = vmatpush3.bf16.msra.mxu0 %v535_v18 }
  0x56   :  { %493 = vmatprep.subr.bf16.mxu0 %v655_v0  ;;  %344 = vmatpush1.bf16.msra.mxu1 %v550_v29 }
  0x59   :  { %494 = vmatpush3.bf16.msra.mxu0 %v539_v21 }
  0x5a   :  { %495 = vmatprep.subr.bf16.mxu0 %v655_v0 }
  0x5d   :  { %496 = vmatpush3.bf16.msra.mxu0 %v543_v24 }
  0x5e   :  { %497 = vmatprep.subr.bf16.mxu0 %v655_v0 }
  0x61   :  { %498 = vmatpush3.bf16.msra.mxu0 %v547_v27 }
  0x62   :  { %499 = vmatprep.subr.bf16.mxu0 %v655_v0 }
  0x65   :  { %500 = vmatpush3.bf16.msra.mxu0 %v551_v30 }
 0x11b   :  { %v140_v33 = vpop.f32.mrb[0].mxu0 }
 0x11c   :  { %v141_v34 = vadd.f32 %v429_v32, %v140_v33  ;;  %v483_v35 = vpop.f32.mrb[1].mxu0 }
 0x11d   :  { %v143_v36 = vpop.f32.mrb[2].mxu0 }
 0x11e   :  { %v147_v37 = vmul.f32 0.70710677, %v141_v34  ;;  %v484_v38 = vpop.f32.mrb[3].mxu0  ;;  %v146_v40 = vmul.f32 0.5, %v141_v34 }
 0x120   :  { %552 = verf.f32 %v147_v37 }
 0x12a   :  { %v553_v39 = vpop.eup %552 }
 0x12b   :  { %v149_v41 = vadd.f32 1.0, %v553_v39 }
 0x12d   :  { %v150_v42 = vmul.f32 %v149_v41, %v146_v40 }
 0x12f   :  { %v151_v43 = vpack.c.bf16 %v150_v42, %v150_v42 }
 0x131   :  { %362 = vmatmul.mubr.bf16.vlgmr.msra.gmra.mrb[0].mxu1 %v151_v43  ;;  %502 = vmatmul.mubr.bf16.vlgmr.msra.gmra.mrb[4].mxu0 %v151_v43 }
 0x204   :  { %v363_v53 = vpop.f32.mrb[0].mxu1  ;;  %v404_v54 = vpop.f32.mrb[4].mxu0 }
 0x205   :  { %v364_v55 = vadd.f32 %v363_v53, %v189_v50  ;;  %v405_v56 = vadd.f32 %v404_v54, %v197_v51  ;;  %v365_v57 = vpop.f32.mrb[1].mxu1  ;;  %v503_v58 = vpop.f32.mrb[5].mxu0 }
 0x206   :  { %v366_v59 = vadd.f32 %v365_v57, %v193_v52  ;;  %v367_v60 = vpop.f32.mrb[2].mxu1  ;;  %v407_v61 = vpop.f32.mrb[6].mxu0 }
 0x207   :  { %410 = vst [vmem:[#allocation8] sm:$0xff] %v364_v55  ;;  %412 = vst [vmem:[#allocation8 + $0x10] sm:$0xff] %v405_v56  ;;  %v368_v62 = vpop.f32.mrb[3].mxu1  ;;  %v504_v63 = vpop.f32.mrb[7].mxu0 }
 0x208   :  { %411 = vst [vmem:[#allocation8 + $0x8] sm:$0xff] %v366_v59 }
 0x209   :  { %631 = shalt.err (!%p628_p0)
}
 0x20a   :  { %s632_s12 = scalar_lea.hbm %s764_s5, 384 }
 0x20b   :  { %p633_p1 = scmp.ne.s32.totalorder %s764_s5, %s632_s12  ;;  %p636_p2 = scmp.lt.u32.totalorder %s632_s12, %s764_s5 }
 0x20d   :  { %p638_p3 = pnand %p636_p2, %p633_p1 }
 0x20f   :  { %641 = shalt.err (!%p638_p3)
}
 0x210   :  { %422 = dma.vmem_to_hbm [thread:$0]  %s420_s9, 384, %s764_s5, [#allocation4]  }
 0x211   :  { %646 = dma.done.wait [#allocation4], 384  }
 0x212   :  { %647 = vsyncadd [#allocation4], 4294966912 }
 0x213   :  { %426 = vsyncpa [#allocation3], 1 }
 0x214   :  { %427 = vsyncpa [#allocation6], 1 }
 0x215   :  { %428 = vsyncpa [#allocation4], 1 }

</bundles_post_ra>
